<compile_context>
chip_gen: v5e
topology: v5e:2x2
jax: 0.10.0
libtpu: 0.0.40
codegen_flags: <defaults>
</compile_context>

<pallas_src>
import jax
import jax.numpy as jnp
from jax.experimental import pallas as pl
from jax.experimental.pallas import tpu as pltpu


def _ca_layer_kernel(x_ref, w1_ref, b1_ref, w2_ref, b2_ref, o_ref):
    # x_ref / o_ref block: (TB, C, HW) -- TB batch elements per grid step.
    x = x_ref[...]                                        # native dtype (f32/bf16)
    tb, c, hw = x.shape
    hid = w1_ref.shape[0]

    # 1) global average pool over the spatial (lane) axis; accumulate in f32.
    pooled = jnp.sum(x.astype(jnp.float32), axis=-1, keepdims=True) * (1.0 / hw)
    # pooled: (TB, C, 1)

    # 2) squeeze 1x1 conv (C -> hid) + bias + ReLU, batched across TB in one
    #    dot_general (== einsum 'toc,tcx->tox'); no per-element matvecs.
    dn = (((2,), (1,)), ((0,), (0,)))                     # contract c, batch t
    w1b = jnp.broadcast_to(w1_ref[...][None], (tb, hid, c))
    h = jax.lax.dot_general(w1b, pooled, dn, preferred_element_type=jnp.float32)
    h = jnp.maximum(h + b1_ref[...], 0.0)                 # (TB, hid, 1)

    # 3) excite 1x1 conv (hid -> C) + bias + sigmoid, batched across TB.
    w2b = jnp.broadcast_to(w2_ref[...][None], (tb, c, hid))
    s = jax.lax.dot_general(w2b, h, dn, preferred_element_type=jnp.float32)
    s = jax.nn.sigmoid(s + b2_ref[...])                   # (TB, C, 1)

    # 4) channel-wise rescale in the input's native dtype, broadcast over HW.
    o_ref[...] = (x * s.astype(x.dtype)).astype(o_ref.dtype)


def ca_layer(x, w1, b1, w2, b2, *, target_block_bytes=1 << 20):
    """Pallas TPU CALayer.forward: x * sigmoid(conv1x1(relu(conv1x1(avgpool(x))))).

    x  : (N, C, H, W)
    w1 : (hidden, C, 1, 1)  conv_du[0].weight     b1 : (hidden,)  conv_du[0].bias
    w2 : (C, hidden, 1, 1)  conv_du[2].weight     b2 : (C,)       conv_du[2].bias
    """
    n, c, h, w = x.shape
    hid = w1.shape[0]
    hw = h * w

    # Layout plumbing (zero cost): lane-dense spatial axis, 2-D weight mats.
    # TODO(synk): if H*W is not a multiple of 128, pad/fold the lane axis so
    # output stores stay unmasked (HW=256 here is already lane-dense).
    # TODO(synk): for C < 8 the (C, HW) vreg tiles are half-empty on the
    # rescale path; a (N*C, HW) 2-D packing would fix that but needs an
    # in-kernel regroup of the per-channel scales.
    x2 = x.reshape(n, c, hw)
    w1m = w1.reshape(hid, c).astype(jnp.float32)
    b1m = b1.reshape(hid, 1).astype(jnp.float32)
    w2m = w2.reshape(c, hid).astype(jnp.float32)
    b2m = b2.reshape(c, 1).astype(jnp.float32)

    # Pick TB (batch elements per grid step): blocks sized toward
    # target_block_bytes to amortize per-step overhead; tiny problems collapse
    # to a single whole-array step; larger problems keep >= 2 steps so the
    # "parallel" grid axis can be sharded across v7x's two TensorCores.
    bytes_per_batch = c * hw * x.dtype.itemsize
    total_bytes = n * bytes_per_batch
    if total_bytes <= 2 * target_block_bytes:
        tb = n
    else:
        tb_cap = max(1, target_block_bytes // bytes_per_batch)
        tb_cap = min(tb_cap, max(1, n // 2))
        tb = max(d for d in range(1, n + 1) if n % d == 0 and d <= tb_cap)
    grid_n = n // tb
    block_bytes = tb * bytes_per_batch

    # VMEM budget: double-buffered input + output blocks + resident weights.
    vmem_limit = int(min(48 << 20, max(32 << 20, 4 * block_bytes + (4 << 20))))

    cost = pl.CostEstimate(
        flops=int(n * (c * hw            # pooling adds
                       + 2 * hid * c     # squeeze matmul
                       + 2 * c * hid     # excite matmul
                       + c * hw)),       # rescale multiply
        transcendentals=int(n * c),      # sigmoid
        bytes_accessed=int(2 * n * c * hw * x.dtype.itemsize
                           + (hid * c + c * hid + hid + c) * 4),
    )

    out = pl.pallas_call(
        _ca_layer_kernel,
        out_shape=jax.ShapeDtypeStruct((n, c, hw), x.dtype),
        grid_spec=pltpu.PrefetchScalarGridSpec(
            num_scalar_prefetch=0,
            grid=(grid_n,),
            in_specs=[
                pl.BlockSpec((tb, c, hw), lambda i: (i, 0, 0)),   # x slab
                pl.BlockSpec((hid, c), lambda i: (0, 0)),         # w1 (resident)
                pl.BlockSpec((hid, 1), lambda i: (0, 0)),         # b1 (resident)
                pl.BlockSpec((c, hid), lambda i: (0, 0)),         # w2 (resident)
                pl.BlockSpec((c, 1), lambda i: (0, 0)),           # b2 (resident)
            ],
            out_specs=pl.BlockSpec((tb, c, hw), lambda i: (i, 0, 0)),
        ),
        compiler_params=pltpu.CompilerParams(
            dimension_semantics=("parallel",),
            vmem_limit_bytes=vmem_limit,
        ),
        cost_estimate=cost,
        input_output_aliases={0: 0},     # x is consumed; reuse its HBM buffer
    )(x2, w1m, b1m, w2m, b2m)

    return out.reshape(n, c, h, w)


def _ca_layer_ref(x, w1, b1, w2, b2):
    """Pure-JAX reference matching the PyTorch CALayer forward."""
    hid, c = w1.shape[0], w1.shape[1]
    y = jnp.mean(x, axis=(2, 3), keepdims=True)                    # (N, C, 1, 1)
    y = jnp.einsum('nchw,oc->nohw', y, w1.reshape(hid, c)) + b1.reshape(1, hid, 1, 1)
    y = jnp.maximum(y, 0.0)
    y = jnp.einsum('nchw,oc->nohw', y, w2.reshape(c, hid)) + b2.reshape(1, c, 1, 1)
    y = jax.nn.sigmoid(y)
    return x * y


if __name__ == "__main__":
    key = jax.random.PRNGKey(0)
    k_x, k_w1, k_b1, k_w2, k_b2 = jax.random.split(key, 5)

    N, C, H, W = 2, 4, 16, 16
    HIDDEN = 4  # spec hard-codes nn.Conv2d(channel, 4, 1)

    x = jax.random.normal(k_x, (N, C, H, W), dtype=jnp.float32)
    w1 = jax.random.normal(k_w1, (HIDDEN, C, 1, 1), dtype=jnp.float32) * 0.5
    b1 = jax.random.normal(k_b1, (HIDDEN,), dtype=jnp.float32) * 0.1
    w2 = jax.random.normal(k_w2, (C, HIDDEN, 1, 1), dtype=jnp.float32) * 0.5
    b2 = jax.random.normal(k_b2, (C,), dtype=jnp.float32) * 0.1

    y = ca_layer(x, w1, b1, w2, b2)
    jax.block_until_ready(y)

    y_ref = _ca_layer_ref(x, w1, b1, w2, b2)
    assert y.shape == x.shape and y.dtype == x.dtype
    assert bool(jnp.allclose(y, y_ref, atol=1e-5, rtol=1e-5)), (
        f"max abs err = {float(jnp.max(jnp.abs(y - y_ref)))}")
    print("KERNEL_OK")
</pallas_src>

<mosaic_0001>
module attributes {stable_mosaic.version = 11 : i64} {
  func.func @_ca_layer_kernel(%arg0: i32, %arg1: memref<2x4x256xf32, #tpu.memory_space<vmem>>, %arg2: memref<4x4xf32, #tpu.memory_space<vmem>>, %arg3: memref<4x1xf32, #tpu.memory_space<vmem>>, %arg4: memref<4x4xf32, #tpu.memory_space<vmem>>, %arg5: memref<4x1xf32, #tpu.memory_space<vmem>>, %arg6: memref<2x4x256xf32, #tpu.memory_space<vmem>>) attributes {dimension_semantics = [#tpu.dimension_semantics<parallel>], iteration_bounds = array<i64: 1>, scalar_prefetch = 0 : i64, scratch_operands = 0 : i64, tpu.core_type = #tpu.core_type<tc>, window_params = [{transform_indices = @transform_0, window_bounds = array<i64: 2, 4, 256>}, {pipeline_mode = #tpu.pipeline_mode<synchronous>, transform_indices = @transform_1, window_bounds = array<i64: 4, 4>}, {pipeline_mode = #tpu.pipeline_mode<synchronous>, transform_indices = @transform_2, window_bounds = array<i64: 4, 1>}, {pipeline_mode = #tpu.pipeline_mode<synchronous>, transform_indices = @transform_3, window_bounds = array<i64: 4, 4>}, {pipeline_mode = #tpu.pipeline_mode<synchronous>, transform_indices = @transform_4, window_bounds = array<i64: 4, 1>}, {transform_indices = @transform_5, window_bounds = array<i64: 2, 4, 256>}]} {
    %c0 = arith.constant 0 : index
    %c0_0 = arith.constant 0 : index
    %c0_1 = arith.constant 0 : index
    %0 = vector.load %arg1[%c0, %c0_0, %c0_1] : memref<2x4x256xf32, #tpu.memory_space<vmem>>, vector<2x4x256xf32>
    %cst = arith.constant dense<0.000000e+00> : vector<2x4xf32>
    %1 = vector.multi_reduction <add>, %0, %cst [2] : vector<2x4x256xf32> to vector<2x4xf32>
    %2 = vector.shape_cast %1 : vector<2x4xf32> to vector<2x4x1xf32>
    %cst_2 = arith.constant 3.906250e-03 : f32
    %3 = vector.broadcast %cst_2 : f32 to vector<2x4x1xf32>
    %4 = arith.mulf %2, %3 : vector<2x4x1xf32>
    %c0_3 = arith.constant 0 : index
    %c0_4 = arith.constant 0 : index
    %5 = vector.load %arg2[%c0_3, %c0_4] : memref<4x4xf32, #tpu.memory_space<vmem>>, vector<4x4xf32>
    %6 = vector.shape_cast %5 : vector<4x4xf32> to vector<1x4x4xf32>
    %7 = vector.shape_cast %6 : vector<1x4x4xf32> to vector<1x4x4xf32>
    %8 = vector.broadcast %7 : vector<1x4x4xf32> to vector<2x4x4xf32>
    %cst_5 = arith.constant dense<0.000000e+00> : vector<2x4x1xf32>
    %9 = tpu.matmul %8, %4, %cst_5 {dimension_numbers = #tpu.dot_dimension_numbers<[2], [1], [1], [2], [0, 0, 0, 1, 1, 2], [0], [0]>} : vector<2x4x4xf32>, vector<2x4x1xf32>, vector<2x4x1xf32> -> vector<2x4x1xf32>
    %c0_6 = arith.constant 0 : index
    %c0_7 = arith.constant 0 : index
    %10 = vector.load %arg3[%c0_6, %c0_7] : memref<4x1xf32, #tpu.memory_space<vmem>>, vector<4x1xf32>
    %11 = vector.shape_cast %10 : vector<4x1xf32> to vector<1x4x1xf32>
    %12 = vector.broadcast %11 : vector<1x4x1xf32> to vector<2x4x1xf32>
    %13 = arith.addf %9, %12 : vector<2x4x1xf32>
    %cst_8 = arith.constant 0.000000e+00 : f32
    %14 = vector.broadcast %cst_8 : f32 to vector<2x4x1xf32>
    %15 = arith.maximumf %13, %14 : vector<2x4x1xf32>
    %c0_9 = arith.constant 0 : index
    %c0_10 = arith.constant 0 : index
    %16 = vector.load %arg4[%c0_9, %c0_10] : memref<4x4xf32, #tpu.memory_space<vmem>>, vector<4x4xf32>
    %17 = vector.shape_cast %16 : vector<4x4xf32> to vector<1x4x4xf32>
    %18 = vector.shape_cast %17 : vector<1x4x4xf32> to vector<1x4x4xf32>
    %19 = vector.broadcast %18 : vector<1x4x4xf32> to vector<2x4x4xf32>
    %cst_11 = arith.constant dense<0.000000e+00> : vector<2x4x1xf32>
    %20 = tpu.matmul %19, %15, %cst_11 {dimension_numbers = #tpu.dot_dimension_numbers<[2], [1], [1], [2], [0, 0, 0, 1, 1, 2], [0], [0]>} : vector<2x4x4xf32>, vector<2x4x1xf32>, vector<2x4x1xf32> -> vector<2x4x1xf32>
    %c0_12 = arith.constant 0 : index
    %c0_13 = arith.constant 0 : index
    %21 = vector.load %arg5[%c0_12, %c0_13] : memref<4x1xf32, #tpu.memory_space<vmem>>, vector<4x1xf32>
    %22 = vector.shape_cast %21 : vector<4x1xf32> to vector<1x4x1xf32>
    %23 = vector.broadcast %22 : vector<1x4x1xf32> to vector<2x4x1xf32>
    %24 = arith.addf %20, %23 : vector<2x4x1xf32>
    %25 = arith.negf %24 : vector<2x4x1xf32>
    %26 = math.exp %25 : vector<2x4x1xf32>
    %cst_14 = arith.constant 1.000000e+00 : f32
    %27 = vector.broadcast %cst_14 : f32 to vector<2x4x1xf32>
    %28 = arith.addf %27, %26 : vector<2x4x1xf32>
    %29 = arith.divf %27, %28 : vector<2x4x1xf32>
    %30 = vector.broadcast %29 : vector<2x4x1xf32> to vector<2x4x256xf32>
    %31 = arith.mulf %0, %30 : vector<2x4x256xf32>
    %c0_15 = arith.constant 0 : index
    %c0_16 = arith.constant 0 : index
    %c0_17 = arith.constant 0 : index
    %32 = vector.load %arg6[%c0_15, %c0_16, %c0_17] : memref<2x4x256xf32, #tpu.memory_space<vmem>>, vector<2x4x256xf32>
    tpu.vector_store %arg6[%c0_15, %c0_16, %c0_17], %31 {strides = array<i32>} : memref<2x4x256xf32, #tpu.memory_space<vmem>>, vector<2x4x256xf32>,
    return
  }
  func.func @transform_0(%arg0: i32) -> (i32, i32, i32) {
    %c0_i32 = arith.constant 0 : i32
    %c0_i32_0 = arith.constant 0 : i32
    %c0_i32_1 = arith.constant 0 : i32
    return %arg0, %c0_i32, %c0_i32_0 : i32, i32, i32
  }
  func.func @transform_1(%arg0: i32) -> (i32, i32) {
    %c0_i32 = arith.constant 0 : i32
    %c0_i32_0 = arith.constant 0 : i32
    %c0_i32_1 = arith.constant 0 : i32
    return %c0_i32, %c0_i32_0 : i32, i32
  }
  func.func @transform_2(%arg0: i32) -> (i32, i32) {
    %c0_i32 = arith.constant 0 : i32
    %c0_i32_0 = arith.constant 0 : i32
    %c0_i32_1 = arith.constant 0 : i32
    return %c0_i32, %c0_i32_0 : i32, i32
  }
  func.func @transform_3(%arg0: i32) -> (i32, i32) {
    %c0_i32 = arith.constant 0 : i32
    %c0_i32_0 = arith.constant 0 : i32
    %c0_i32_1 = arith.constant 0 : i32
    return %c0_i32, %c0_i32_0 : i32, i32
  }
  func.func @transform_4(%arg0: i32) -> (i32, i32) {
    %c0_i32 = arith.constant 0 : i32
    %c0_i32_0 = arith.constant 0 : i32
    %c0_i32_1 = arith.constant 0 : i32
    return %c0_i32, %c0_i32_0 : i32, i32
  }
  func.func @transform_5(%arg0: i32) -> (i32, i32, i32) {
    %c0_i32 = arith.constant 0 : i32
    %c0_i32_0 = arith.constant 0 : i32
    %c0_i32_1 = arith.constant 0 : i32
    return %arg0, %c0_i32, %c0_i32_0 : i32, i32, i32
  }
}

</mosaic_0001>

<bundles_post_ra>
// kernel: tpu_custom_call.1
= control target key start
LH: loop header
LB: loop body
LE: loop exit
PB: predicated region body
PF: predicated region fallthrough
CT: control target
= control target key end

     0   :  { %10 = vsyncpa [#allocation3], 0  ;;  %s407_s0 = inlined_call_operand.hbm [shape: f32[2,4,256], index: 0, kind: input, shape index: {}, may-alias: {0,5}]   ;;  %s408_s1 = inlined_call_operand.vmem [shape: f32[4,4], index: 1, kind: input, shape index: {}]   ;;  %s409_s2 = inlined_call_operand.vmem [shape: f32[4,1], index: 2, kind: input, shape index: {}]   ;;  %s410_s3 = inlined_call_operand.vmem [shape: f32[4,4], index: 3, kind: input, shape index: {}]   ;;  %s411_s4 = inlined_call_operand.vmem [shape: f32[4,1], index: 4, kind: input, shape index: {}]   ;;  %s412_s5 = inlined_call_operand.hbm [shape: f32[2,4,256], index: 5, kind: output, shape index: {}, may-alias: {0,5}]  }
   0x1   :  { %11 = vsyncpa [#allocation4], 0  ;;  %s16_s20 = sshll.u32 %s407_s0, 4  ;;  %s327_s21 = smov [#allocation2]   ;;  %s17_s20 = int_to_ptr.hbm [resolvable:$true] %s16_s20 }
   0x2   :  { %s18_s22 = sshll.u32 %s327_s21, 4  ;;  %s328_s23 = smov 128   ;;  %s19_s22 = int_to_ptr.vmem [resolvable:$true] %s18_s22 }
   0x3   :  { %s329_s24 = smov 8  }
   0x4   :  { %24 = dma.hbm_to_vmem [thread:$0]  %s17_s20, 256, %s19_s22, [#allocation3], %s328_s23, %s328_s23, %s329_s24  }
   0x5   :  { %323 = dma.done.wait [#allocation3], 256  }
   0x6   :  { %324 = vsyncadd [#allocation3], 4294967040  ;;  %v369_v0 = vld [vmem:[#allocation2] sm:$0xff]  ;;  %v371_v1 = vld [vmem:[#allocation2 + $0x8] sm:$0xff]  ;;  %vm52_vm0 = vcmask 1043456   ;;  %vm67_vm1 = vcmask 31744  }
   0x7   :  { %41 = vst [vmem:[#allocation1] ss:$2 sm:$0xff] %v369_v0  ;;  %v65_v14 = vld [vmem:[%s408_s1] sm:$0xf]  ;;  %v330_v25 = vmov 0   ;;  %s236_s7 = sshll.u32 %s412_s5, 4  ;;  %s237_s7 = int_to_ptr.hbm [resolvable:$true] %s236_s7 }
   0x8   :  { %45 = vst [vmem:[#allocation1 + $0x10] ss:$2 sm:$0xff] %v371_v1  ;;  %v66_v17 = vld [vmem:[%s409_s2] sm:$0xf]  ;;  %265 = vset.pattern.permute.xlu1 %v330_v25  ;;  %266 = vset.pattern.permute.xlu0 %v330_v25  ;;  %v331_v57 = vmov 839922192  }
   0x9   :  { %v119_v21 = vld [vmem:[%s410_s3] sm:$0xf]  ;;  %v217_v58 = vunpack.c.l.s4 %v331_v57  ;;  %s332_s3 = smov [#allocation5]  }
   0xa   :  { %v120_v26 = vld [vmem:[%s411_s4] sm:$0xf]  ;;  %s234_s4 = sshll.u32 %s332_s3, 4  ;;  %s235_s4 = int_to_ptr.vmem [resolvable:$true] %s234_s4 }
   0xb   :  { %v218_v59 = vunpack.c.0.s8 %v217_v58 }
   0xe   :  { %v42_v2 = vld.sshfl [vmem:[#allocation1] sm:$0xff pattern:$0x75316420]  ;;  %v43_v3 = vld.sshfl [vmem:[#allocation1 + $0x8] sm:$0xff pattern:$0x75316420] }
   0xf   :  { %v53_v4 = vsel %vm52_vm0, %v42_v2, 0.0  ;;  %v54_v5 = vsel %vm52_vm0, %v43_v3, 0.0  ;;  %v46_v7 = vld.sshfl [vmem:[#allocation1 + $0x10] sm:$0xff pattern:$0x75316420] }
  0x10   :  { %v55_v6 = vadd.f32 %v54_v5, %v53_v4  ;;  %v47_v8 = vld.sshfl [vmem:[#allocation1 + $0x18] sm:$0xff pattern:$0x75316420]  ;;  %v58_v9 = vsel %vm52_vm0, %v46_v7, 0.0 }
  0x11   :  { %v59_v10 = vsel %vm52_vm0, %v47_v8, 0.0 }
  0x12   :  { %56 = vadd.xlane.f32.xlu0 %v55_v6  ;;  %v60_v11 = vadd.f32 %v59_v10, %v58_v9 }
  0x1a   :  { %61 = vadd.xlane.f32.xlu0 %v60_v11 }
  0x85   :  { %v57_v12 = vpop.xlane.xlu0 %56 }
  0x86   :  { %v63_v13 = vmul.f32 0.00390625, %v57_v12 }
  0x88   :  { %249 = vmatpush.msk.msra.mxu0 %vm52_vm0, %v63_v13 }
  0x89   :  { %250 = vmatmul.msk.f32.vlgmr.msra.gmra.mxu0 %vm67_vm1, %v65_v14 }
  0x8d   :  { %v62_v15 = vpop.xlane.xlu0 %61 }
  0x8e   :  { %v64_v16 = vmul.f32 0.00390625, %v62_v15 }
  0x90   :  { %251 = vmatpush.msk.msra.mxu1 %vm52_vm0, %v64_v16 }
  0x91   :  { %252 = vmatmul.msk.f32.vlgmr.msra.gmra.mxu1 %vm67_vm1, %v65_v14 }
 0x106   :  { %v91_v18 = vpop.f32.mrf.mxu0 }
 0x107   :  { %v92_v19 = vadd.f32 %v91_v18, %v66_v17 }
 0x109   :  { %v117_v20 = vmax.f32 %v92_v19, 0.0 }
 0x10b   :  { %253 = vmatpush.msk.msra.mxu2 %vm52_vm0, %v117_v20 }
 0x10c   :  { %254 = vmatmul.msk.f32.vlgmr.msra.gmra.mxu2 %vm67_vm1, %v119_v21 }
 0x10e   :  { %v114_v22 = vpop.f32.mrf.mxu1 }
 0x10f   :  { %v115_v23 = vadd.f32 %v114_v22, %v66_v17 }
 0x111   :  { %v118_v24 = vmax.f32 %v115_v23, 0.0 }
 0x113   :  { %255 = vmatpush.msk.msra.mxu3 %vm52_vm0, %v118_v24 }
 0x114   :  { %256 = vmatmul.msk.f32.vlgmr.msra.gmra.mxu3 %vm67_vm1, %v119_v21 }
 0x18f   :  { %v144_v27 = vpop.f32.mrf.mxu2 }
 0x190   :  { %v145_v28 = vadd.f32 %v144_v27, %v120_v26 }
 0x192   :  { %v257_v29 = vmul.f32 -1.442695, %v145_v28 }
 0x194   :  { %267 = vpow2.f32 %v257_v29 }
 0x197   :  { %v167_v30 = vpop.f32.mrf.mxu3 }
 0x198   :  { %v168_v31 = vadd.f32 %v167_v30, %v120_v26 }
 0x19a   :  { %v268_v32 = vpop.eup %267  ;;  %v258_v33 = vmul.f32 -1.442695, %v168_v31 }
 0x19b   :  { %v176_v34 = vadd.f32 1.0, %v268_v32 }
 0x19c   :  { %269 = vpow2.f32 %v258_v33 }
 0x19d   :  { %271 = vrcp.f32 %v176_v34  ;;  %v189_v40 = vand.u32 2147483648, %v176_v34  ;;  %v187_v42 = vand.u32 2147483647, %v176_v34  ;;  %vm183_vm3 = vweird.f32 %v176_v34 }
 0x19f   :  { %v190_v45 = vor.u32 1.1754944e-38, %v189_v40  ;;  %vm188_vm5 = vcmp.eq.f32.partialorder %v187_v42, 8.507059e+37 }
 0x1a2   :  { %v270_v35 = vpop.eup %269 }
 0x1a3   :  { %v272_v36 = vpop.eup %271  ;;  %v177_v37 = vadd.f32 1.0, %v270_v35 }
 0x1a4   :  { %v179_v38 = vmul.f32 %v272_v36, %v176_v34  ;;  %vm184_vm2 = vweird.f32 %v272_v36 }
 0x1a5   :  { %273 = vrcp.f32 %v177_v37  ;;  %vm185_vm4 = vmor %vm183_vm3, %vm184_vm2  ;;  %v204_v50 = vand.u32 2147483648, %v177_v37  ;;  %v202_v52 = vand.u32 2147483647, %v177_v37  ;;  %vm198_vm7 = vweird.f32 %v177_v37 }
 0x1a6   :  { %v180_v39 = vsub.f32 1.0, %v179_v38 }
 0x1a7   :  { %v205_v54 = vor.u32 1.1754944e-38, %v204_v50  ;;  %vm203_vm9 = vcmp.eq.f32.partialorder %v202_v52, 8.507059e+37 }
 0x1a8   :  { %v181_v41 = vmul.f32 %v272_v36, %v180_v39 }
 0x1aa   :  { %v182_v43 = vadd.f32 %v272_v36, %v181_v41 }
 0x1ab   :  { %v274_v44 = vpop.eup %273 }
 0x1ac   :  { %v186_v46 = vsel %vm185_vm4, %v272_v36, %v182_v43  ;;  %v194_v47 = vmul.f32 %v274_v44, %v177_v37  ;;  %vm199_vm6 = vweird.f32 %v274_v44 }
 0x1ad   :  { %v191_v48 = vsel %vm188_vm5, %v190_v45, %v186_v46  ;;  %vm200_vm8 = vmor %vm198_vm7, %vm199_vm6 }
 0x1ae   :  { %210 = vperm.xlu1 %265, %v191_v48   ;;  %v195_v49 = vsub.f32 1.0, %v194_v47 }
 0x1b0   :  { %v196_v51 = vmul.f32 %v274_v44, %v195_v49 }
 0x1b2   :  { %v197_v53 = vadd.f32 %v274_v44, %v196_v51 }
 0x1b4   :  { %v201_v55 = vsel %vm200_vm8, %v274_v44, %v197_v53 }
 0x1b5   :  { %v206_v56 = vsel %vm203_vm9, %v205_v54, %v201_v55 }
 0x1b6   :  { %214 = vperm.xlu1 %265, %v206_v56  }
 0x220   :  { %v211_v60 = vpop.permute.xlu1 %210 }
 0x221   :  { %v219_v61 = vperm.slane %v211_v60, %v218_v59 }
 0x223   :  { %v226_v62 = vmul.f32 %v219_v61, %v369_v0 }
 0x225   :  { %228 = vst [vmem:[#allocation5] sm:$0xff] %v226_v62 }
 0x228   :  { %v215_v63 = vpop.permute.xlu1 %214 }
 0x229   :  { %v223_v2 = vperm.slane %v215_v63, %v218_v59 }
 0x22b   :  { %v227_v3 = vmul.f32 %v223_v2, %v371_v1 }
 0x22d   :  { %229 = vst [vmem:[#allocation5 + $0x8] sm:$0xff] %v227_v3 }
 0x22e   :  { %242 = dma.vmem_to_hbm [thread:$0]  %s235_s4, 256, %s237_s7, [#allocation4], %s328_s23, %s328_s23, %s329_s24  }
 0x22f   :  { %325 = dma.done.wait [#allocation4], 256  }
 0x230   :  { %326 = vsyncadd [#allocation4], 4294967040 }
 0x231   :  { %247 = vsyncpa [#allocation3], 1 }
 0x232   :  { %248 = vsyncpa [#allocation4], 1 }

</bundles_post_ra>
